<compile_context>
chip_gen: v7x
topology: tpu7x:2x2x1
jax: 0.10.0
libtpu: 0.0.40
codegen_flags: <defaults>
</compile_context>

<pallas_src>
import jax
import jax.numpy as jnp
import numpy as np
from jax.experimental import pallas as pl
from jax.experimental.pallas import tpu as pltpu


def mlp_kernel(x_ref, w1_ref, b1_ref, w2_ref, b2_ref, w3_ref, b3_ref, o_ref):
    cdt = w1_ref.dtype  # operand dtype: bf16 (fast path) or f32 (exact path)

    # In-kernel cast of x (VPU op, hidden under DMA/MXU slack).
    x = x_ref[...].astype(cdt)

    # Layer 1: Linear (MXU, f32 accumulation) + bias + tanh, bias/tanh in f32 on the
    # real 32 hidden columns (no lane padding anywhere).
    h1 = jnp.tanh(
        jnp.dot(x, w1_ref[...], preferred_element_type=jnp.float32) + b1_ref[...]
    )
    # Layer 2.
    h2 = jnp.tanh(
        jnp.dot(h1.astype(cdt), w2_ref[...], preferred_element_type=jnp.float32)
        + b2_ref[...]
    )
    # Layer 3: Linear, no activation.
    out = (
        jnp.dot(h2.astype(cdt), w3_ref[...], preferred_element_type=jnp.float32)
        + b3_ref[...]
    )
    o_ref[...] = out.astype(o_ref.dtype)


def _round_up(n, m):
    return ((n + m - 1) // m) * m


def prepare_params(params, *, use_bf16=True):
    """One-time parameter conversion (hoisted out of the per-call forward path).

    Weights -> MXU operand dtype (bf16 fast path / f32 exact path), stored
    [in_features, out_features].  Biases -> f32 rows of shape (1, out_features) so the
    bias add and tanh run on the f32 accumulator.
    """
    w1, b1, w2, b2, w3, b3 = params
    wdt = jnp.bfloat16 if use_bf16 else jnp.float32

    def w_(w):
        return jnp.asarray(w, wdt)

    def b_(b):
        return jnp.asarray(b, jnp.float32).reshape(1, -1)

    return (w_(w1), b_(b1), w_(w2), b_(b2), w_(w3), b_(b3))


def rasmus_network_forward(x, prepared_params, *, block_rows=None):
    """Full 3-layer MLP forward as a single batch-tiled Pallas kernel.

    `prepared_params` must come from prepare_params() (already in kernel layout/dtype).
    """
    w1, b1, w2, b2, w3, b3 = prepared_params
    B, K = x.shape
    H = w1.shape[1]
    O = w3.shape[1]
    out_dtype = x.dtype

    # Only the batch/sublane dim needs rounding (to a multiple of 8).  The lane dims
    # K/H/O stay at their real widths: block last dim == full array dim satisfies the
    # (8,128) rule and keeps HBM traffic minimal.
    B8 = _round_up(B, 8)
    if block_rows is None:
        # Single grid step for small/medium batches (per-step overhead dominates);
        # 1024-row tiles (>=2 "parallel" steps, so v7x's 2 TCs both get work) beyond.
        TB = B8 if B8 <= 1024 else 1024
    else:
        TB = min(_round_up(block_rows, 8), B8)
    B_p = _round_up(B8, TB)

    if B_p != B:
        # Batch padding only; no lane padding and no dtype cast in the wrapper.
        x = jnp.pad(x, ((0, B_p - B), (0, 0)))

    grid = (B_p // TB,)

    def row_spec(shape):      # streams with the batch grid (double-buffered DMA)
        return pl.BlockSpec(shape, lambda i: (i, 0))

    def const_spec(shape):    # VMEM-resident across all grid steps
        return pl.BlockSpec(shape, lambda i: (0, 0))

    out_p = pl.pallas_call(
        mlp_kernel,
        out_shape=jax.ShapeDtypeStruct((B_p, O), jnp.float32),
        grid=grid,
        in_specs=[
            row_spec((TB, K)),       # x tile (native dtype, real width)
            const_spec((K, H)),      # w1
            const_spec((1, H)),      # b1 (f32)
            const_spec((H, H)),      # w2
            const_spec((1, H)),      # b2 (f32)
            const_spec((H, O)),      # w3
            const_spec((1, O)),      # b3 (f32)
        ],
        out_specs=row_spec((TB, O)),
        compiler_params=pltpu.CompilerParams(
            # Batch steps are independent -> megacore / v7x 2-TC split when grid > 1.
            dimension_semantics=("parallel",),
        ),
    )(x, w1, b1, w2, b2, w3, b3)

    # Strip batch padding; return in the input dtype.
    return out_p[:B].astype(out_dtype)


def init_params(key, input_dim, output_dim, hidden=32, dtype=jnp.float32):
    """Deterministic init mimicking PyTorch's default Linear init (uniform +/- 1/sqrt(fan_in))."""
    keys = jax.random.split(key, 6)

    def linear(kw, kb, fan_in, fan_out):
        bound = 1.0 / np.sqrt(fan_in)
        w = jax.random.uniform(kw, (fan_in, fan_out), dtype, -bound, bound)
        b = jax.random.uniform(kb, (1, fan_out), dtype, -bound, bound)
        return w, b

    w1, b1 = linear(keys[0], keys[1], input_dim, hidden)
    w2, b2 = linear(keys[2], keys[3], hidden, hidden)
    w3, b3 = linear(keys[4], keys[5], hidden, output_dim)
    return (w1, b1, w2, b2, w3, b3)


def reference_forward(x, params):
    w1, b1, w2, b2, w3, b3 = params
    h1 = jnp.tanh(x @ w1 + b1)
    h2 = jnp.tanh(h1 @ w2 + b2)
    return h2 @ w3 + b3


if __name__ == "__main__":
    key = jax.random.PRNGKey(0)
    k_x, k_p = jax.random.split(key)

    batch, input_dim, output_dim = 256, 16, 4
    x = jax.random.normal(k_x, (batch, input_dim), dtype=jnp.float32)
    params = init_params(k_p, input_dim, output_dim)

    ref = reference_forward(x, params)

    # f32-operand path: checks grid/layout/batch-padding correctness against the
    # pure-JAX reference (TPU default matmul precision; contraction dims are tiny).
    p_f32 = prepare_params(params, use_bf16=False)
    out_f32 = jax.block_until_ready(rasmus_network_forward(x, p_f32))
    np.testing.assert_allclose(np.asarray(out_f32), np.asarray(ref),
                               rtol=1e-5, atol=1e-5)

    # bf16-operand path (the performance configuration): f32 accumulation keeps the
    # 3-layer, 32-wide MLP well within 2e-2 of the f32 reference.
    p_bf16 = prepare_params(params, use_bf16=True)
    out_bf16 = jax.block_until_ready(rasmus_network_forward(x, p_bf16))
    np.testing.assert_allclose(np.asarray(out_bf16), np.asarray(ref),
                               rtol=2e-2, atol=2e-2)

    print("KERNEL_OK")
</pallas_src>

<mosaic_0001>
module attributes {stable_mosaic.version = 11 : i64} {
  func.func @mlp_kernel(%arg0: i32, %arg1: memref<256x16xf32, #tpu.memory_space<vmem>>, %arg2: memref<16x32xf32, #tpu.memory_space<vmem>>, %arg3: memref<1x32xf32, #tpu.memory_space<vmem>>, %arg4: memref<32x32xf32, #tpu.memory_space<vmem>>, %arg5: memref<1x32xf32, #tpu.memory_space<vmem>>, %arg6: memref<32x4xf32, #tpu.memory_space<vmem>>, %arg7: memref<1x4xf32, #tpu.memory_space<vmem>>, %arg8: memref<256x4xf32, #tpu.memory_space<vmem>>) attributes {dimension_semantics = [#tpu.dimension_semantics<parallel>], iteration_bounds = array<i64: 1>, scalar_prefetch = 0 : i64, scratch_operands = 0 : i64, tpu.core_type = #tpu.core_type<tc>, window_params = [{transform_indices = @transform_0, window_bounds = array<i64: 256, 16>}, {pipeline_mode = #tpu.pipeline_mode<synchronous>, transform_indices = @transform_1, window_bounds = array<i64: 16, 32>}, {pipeline_mode = #tpu.pipeline_mode<synchronous>, transform_indices = @transform_2, window_bounds = array<i64: 1, 32>}, {pipeline_mode = #tpu.pipeline_mode<synchronous>, transform_indices = @transform_3, window_bounds = array<i64: 32, 32>}, {pipeline_mode = #tpu.pipeline_mode<synchronous>, transform_indices = @transform_4, window_bounds = array<i64: 1, 32>}, {pipeline_mode = #tpu.pipeline_mode<synchronous>, transform_indices = @transform_5, window_bounds = array<i64: 32, 4>}, {pipeline_mode = #tpu.pipeline_mode<synchronous>, transform_indices = @transform_6, window_bounds = array<i64: 1, 4>}, {transform_indices = @transform_7, window_bounds = array<i64: 256, 4>}]} {
    %c0 = arith.constant 0 : index
    %c0_0 = arith.constant 0 : index
    %0 = vector.load %arg1[%c0, %c0_0] : memref<256x16xf32, #tpu.memory_space<vmem>>, vector<256x16xf32>
    %c0_1 = arith.constant 0 : index
    %c0_2 = arith.constant 0 : index
    %1 = vector.load %arg2[%c0_1, %c0_2] : memref<16x32xf32, #tpu.memory_space<vmem>>, vector<16x32xf32>
    %cst = arith.constant dense<0.000000e+00> : vector<256x32xf32>
    %2 = tpu.matmul %0, %1, %cst {dimension_numbers = #tpu.dot_dimension_numbers<[1], [0], [0], [1], [0, 0, 1, 1], [], []>} : vector<256x16xf32>, vector<16x32xf32>, vector<256x32xf32> -> vector<256x32xf32>
    %c0_3 = arith.constant 0 : index
    %c0_4 = arith.constant 0 : index
    %3 = vector.load %arg3[%c0_3, %c0_4] : memref<1x32xf32, #tpu.memory_space<vmem>>, vector<1x32xf32>
    %4 = vector.broadcast %3 : vector<1x32xf32> to vector<256x32xf32>
    %5 = arith.addf %2, %4 : vector<256x32xf32>
    %6 = math.tanh %5 : vector<256x32xf32>
    %c0_5 = arith.constant 0 : index
    %c0_6 = arith.constant 0 : index
    %7 = vector.load %arg4[%c0_5, %c0_6] : memref<32x32xf32, #tpu.memory_space<vmem>>, vector<32x32xf32>
    %cst_7 = arith.constant dense<0.000000e+00> : vector<256x32xf32>
    %8 = tpu.matmul %6, %7, %cst_7 {dimension_numbers = #tpu.dot_dimension_numbers<[1], [0], [0], [1], [0, 0, 1, 1], [], []>} : vector<256x32xf32>, vector<32x32xf32>, vector<256x32xf32> -> vector<256x32xf32>
    %c0_8 = arith.constant 0 : index
    %c0_9 = arith.constant 0 : index
    %9 = vector.load %arg5[%c0_8, %c0_9] : memref<1x32xf32, #tpu.memory_space<vmem>>, vector<1x32xf32>
    %10 = vector.broadcast %9 : vector<1x32xf32> to vector<256x32xf32>
    %11 = arith.addf %8, %10 : vector<256x32xf32>
    %12 = math.tanh %11 : vector<256x32xf32>
    %c0_10 = arith.constant 0 : index
    %c0_11 = arith.constant 0 : index
    %13 = vector.load %arg6[%c0_10, %c0_11] : memref<32x4xf32, #tpu.memory_space<vmem>>, vector<32x4xf32>
    %cst_12 = arith.constant dense<0.000000e+00> : vector<256x4xf32>
    %14 = tpu.matmul %12, %13, %cst_12 {dimension_numbers = #tpu.dot_dimension_numbers<[1], [0], [0], [1], [0, 0, 1, 1], [], []>} : vector<256x32xf32>, vector<32x4xf32>, vector<256x4xf32> -> vector<256x4xf32>
    %c0_13 = arith.constant 0 : index
    %c0_14 = arith.constant 0 : index
    %15 = vector.load %arg7[%c0_13, %c0_14] : memref<1x4xf32, #tpu.memory_space<vmem>>, vector<1x4xf32>
    %16 = vector.broadcast %15 : vector<1x4xf32> to vector<256x4xf32>
    %17 = arith.addf %14, %16 : vector<256x4xf32>
    %c0_15 = arith.constant 0 : index
    %c0_16 = arith.constant 0 : index
    %18 = vector.load %arg8[%c0_15, %c0_16] : memref<256x4xf32, #tpu.memory_space<vmem>>, vector<256x4xf32>
    tpu.vector_store %arg8[%c0_15, %c0_16], %17 {strides = array<i32>} : memref<256x4xf32, #tpu.memory_space<vmem>>, vector<256x4xf32>,
    return
  }
  func.func @transform_0(%arg0: i32) -> (i32, i32) {
    %c0_i32 = arith.constant 0 : i32
    %c0_i32_0 = arith.constant 0 : i32
    return %arg0, %c0_i32 : i32, i32
  }
  func.func @transform_1(%arg0: i32) -> (i32, i32) {
    %c0_i32 = arith.constant 0 : i32
    %c0_i32_0 = arith.constant 0 : i32
    %c0_i32_1 = arith.constant 0 : i32
    return %c0_i32, %c0_i32_0 : i32, i32
  }
  func.func @transform_2(%arg0: i32) -> (i32, i32) {
    %c0_i32 = arith.constant 0 : i32
    %c0_i32_0 = arith.constant 0 : i32
    %c0_i32_1 = arith.constant 0 : i32
    return %c0_i32, %c0_i32_0 : i32, i32
  }
  func.func @transform_3(%arg0: i32) -> (i32, i32) {
    %c0_i32 = arith.constant 0 : i32
    %c0_i32_0 = arith.constant 0 : i32
    %c0_i32_1 = arith.constant 0 : i32
    return %c0_i32, %c0_i32_0 : i32, i32
  }
  func.func @transform_4(%arg0: i32) -> (i32, i32) {
    %c0_i32 = arith.constant 0 : i32
    %c0_i32_0 = arith.constant 0 : i32
    %c0_i32_1 = arith.constant 0 : i32
    return %c0_i32, %c0_i32_0 : i32, i32
  }
  func.func @transform_5(%arg0: i32) -> (i32, i32) {
    %c0_i32 = arith.constant 0 : i32
    %c0_i32_0 = arith.constant 0 : i32
    %c0_i32_1 = arith.constant 0 : i32
    return %c0_i32, %c0_i32_0 : i32, i32
  }
  func.func @transform_6(%arg0: i32) -> (i32, i32) {
    %c0_i32 = arith.constant 0 : i32
    %c0_i32_0 = arith.constant 0 : i32
    %c0_i32_1 = arith.constant 0 : i32
    return %c0_i32, %c0_i32_0 : i32, i32
  }
  func.func @transform_7(%arg0: i32) -> (i32, i32) {
    %c0_i32 = arith.constant 0 : i32
    %c0_i32_0 = arith.constant 0 : i32
    return %arg0, %c0_i32 : i32, i32
  }
}

</mosaic_0001>

<bundles_post_ra>
// kernel: tpu_custom_call.1
= control target key start
LH: loop header
LB: loop body
LE: loop exit
PB: predicated region body
PF: predicated region fallthrough
CT: control target
= control target key end

     0   :  { %vm67_vm0 = vcmask 130048   ;;  %vm432_vm1 = vcmask 261120   ;;  %vm1118_vm2 = vcmask 31744   ;;  %s2217_s1 = inlined_call_operand.vmem [shape: f32[16,32], index: 1, kind: input, shape index: {}]   ;;  %s2218_s0 = inlined_call_operand.vmem [shape: f32[256,16], index: 0, kind: input, shape index: {}]   ;;  %s2219_s3 = inlined_call_operand.vmem [shape: f32[32,32], index: 3, kind: input, shape index: {}]   ;;  %s2220_s5 = inlined_call_operand.vmem [shape: f32[32,4], index: 5, kind: input, shape index: {}]   ;;  %s2221_s2 = inlined_call_operand.vmem [shape: f32[1,32], index: 2, kind: input, shape index: {}]   ;;  %s2222_s4 = inlined_call_operand.vmem [shape: f32[1,32], index: 4, kind: input, shape index: {}]   ;;  %s2223_s6 = inlined_call_operand.vmem [shape: f32[1,4], index: 6, kind: input, shape index: {}]   ;;  %s2224_s7 = inlined_call_operand.vmem [shape: f32[256,4], index: 7, kind: output, shape index: {}]  }
   0x1   :  { %v58_v0 = vld [vmem:[%s2217_s1] sm:$0xff]  ;;  %v59_v1 = vld [vmem:[%s2217_s1 + $0x8] sm:$0xff]  ;;  %v28_v5 = vld [vmem:[%s2218_s0 + $0x10] sm:$0xff] }
   0x2   :  { %v26_v2 = vld [vmem:[%s2218_s0] sm:$0xff]  ;;  %v1524_v3 = vpack.c.bf16 %v59_v1, %v58_v0  ;;  %v27_v4 = vld [vmem:[%s2218_s0 + $0x8] sm:$0xff]  ;;  %v44_v8 = vld [vmem:[%s2218_s0 + $0x90] sm:$0xff] }
   0x3   :  { %1364 = vmatprep.mubr.msk.f32.mxu0 %vm67_vm0, %v26_v2  ;;  %v42_v6 = vld [vmem:[%s2218_s0 + $0x80] sm:$0xff]  ;;  %v43_v7 = vld [vmem:[%s2218_s0 + $0x88] sm:$0xff]  ;;  %v29_v9 = vld [vmem:[%s2218_s0 + $0x18] sm:$0xff] }
   0x4   :  { %1525 = vmatprep.subr.bf16.mxu0 %v1524_v3  ;;  %1544 = vmatprep.subr.bf16.mxu1 %v1524_v3  ;;  %v30_v10 = vld [vmem:[%s2218_s0 + $0x20] sm:$0xff]  ;;  %v45_v11 = vld [vmem:[%s2218_s0 + $0x98] sm:$0xff]  ;;  %v422_v14 = vld [vmem:[%s2219_s3 + $0x8] sm:$0xff] }
   0x5   :  { %1527 = vmatpush3.bf16.msra.mxu0 %v1524_v3  ;;  %1545 = vmatpush3.bf16.msra.mxu1 %v1524_v3  ;;  %v46_v12 = vld [vmem:[%s2218_s0 + $0xa0] sm:$0xff]  ;;  %v31_v15 = vld [vmem:[%s2218_s0 + $0x28] sm:$0xff]  ;;  %v423_v17 = vld [vmem:[%s2219_s3 + $0x10] sm:$0xff] }
   0x6   :  { %1388 = vmatprep.mubr.msk.f32.mxu1 %vm67_vm0, %v42_v6  ;;  %v421_v13 = vld [vmem:[%s2219_s3] sm:$0xff]  ;;  %v424_v18 = vld [vmem:[%s2219_s3 + $0x18] sm:$0xff]  ;;  %v32_v19 = vld [vmem:[%s2218_s0 + $0x30] sm:$0xff] }
   0x7   :  { %v1528_v16 = vpack.c.bf16 %v422_v14, %v421_v13  ;;  %v47_v20 = vld [vmem:[%s2218_s0 + $0xa8] sm:$0xff]  ;;  %v1532_v21 = vpack.c.bf16 %v424_v18, %v423_v17  ;;  %v48_v22 = vld [vmem:[%s2218_s0 + $0xb0] sm:$0xff]  ;;  %v33_v23 = vld [vmem:[%s2218_s0 + $0x38] sm:$0xff] }
   0x8   :  { %1365 = vmatmul.mubr.msk.f32.vlgmr.msra.gmra.mrb[0].mxu0 %vm67_vm0, %v27_v4  ;;  %1389 = vmatmul.mubr.msk.f32.vlgmr.msra.gmra.mrb[0].mxu1 %vm67_vm0, %v43_v7  ;;  %v34_v24 = vld [vmem:[%s2218_s0 + $0x40] sm:$0xff]  ;;  %v49_v25 = vld [vmem:[%s2218_s0 + $0xb8] sm:$0xff]  ;;  %v35_v27 = vld [vmem:[%s2218_s0 + $0x48] sm:$0xff] }
   0x9   :  { %1367 = vmatprep.mubr.msk.f32.mxu0 %vm67_vm0, %v28_v5  ;;  %1391 = vmatprep.mubr.msk.f32.mxu1 %vm67_vm0, %v44_v8  ;;  %v50_v26 = vld [vmem:[%s2218_s0 + $0xc0] sm:$0xff]  ;;  %v36_v28 = vld [vmem:[%s2218_s0 + $0x50] sm:$0xff]  ;;  %v51_v29 = vld [vmem:[%s2218_s0 + $0xc8] sm:$0xff] }
   0xa   :  { %1529 = vmatprep.subr.bf16.mxu1 %v1528_v16  ;;  %v52_v30 = vld [vmem:[%s2218_s0 + $0xd0] sm:$0xff]  ;;  %v37_v31 = vld [vmem:[%s2218_s0 + $0x58] sm:$0xff]  ;;  %v38_v32 = vld [vmem:[%s2218_s0 + $0x60] sm:$0xff] }
   0xb   :  { %1531 = vmatpush3.bf16.msra.mxu1 %v1528_v16  ;;  %v53_v33 = vld [vmem:[%s2218_s0 + $0xd8] sm:$0xff]  ;;  %v54_v34 = vld [vmem:[%s2218_s0 + $0xe0] sm:$0xff]  ;;  %v39_v35 = vld [vmem:[%s2218_s0 + $0x68] sm:$0xff] }
   0xc   :  { %1368 = vmatmul.mubr.msk.f32.gmra.mrb[2].mxu0 %vm67_vm0, %v29_v9  ;;  %1392 = vmatmul.mubr.msk.f32.gmra.mrb[2].mxu1 %vm67_vm0, %v45_v11  ;;  %v40_v36 = vld [vmem:[%s2218_s0 + $0x70] sm:$0xff]  ;;  %v55_v37 = vld [vmem:[%s2218_s0 + $0xe8] sm:$0xff]  ;;  %v41_v39 = vld [vmem:[%s2218_s0 + $0x78] sm:$0xff] }
   0xd   :  { %1370 = vmatprep.mubr.msk.f32.mxu0 %vm67_vm0, %v30_v10  ;;  %1394 = vmatprep.mubr.msk.f32.mxu1 %vm67_vm0, %v46_v12  ;;  %v56_v38 = vld [vmem:[%s2218_s0 + $0xf0] sm:$0xff]  ;;  %v57_v40 = vld [vmem:[%s2218_s0 + $0xf8] sm:$0xff]  ;;  %v786_v41 = vld [vmem:[%s2220_s5] sm:$0xff] }
   0xe   :  { %1533 = vmatprep.subr.bf16.mxu1 %v1532_v21  ;;  %v787_v42 = vld [vmem:[%s2220_s5 + $0x8] sm:$0xff]  ;;  %v788_v43 = vld [vmem:[%s2220_s5 + $0x10] sm:$0xff]  ;;  %v789_v45 = vld [vmem:[%s2220_s5 + $0x18] sm:$0xff] }
   0xf   :  { %1535 = vmatpush3.bf16.msra.mxu1 %v1532_v21  ;;  %v1536_v44 = vpack.c.bf16 %v787_v42, %v786_v41  ;;  %v1540_v46 = vpack.c.bf16 %v789_v45, %v788_v43  ;;  %v1875_v47 = vld [vmem:[%s2221_s2] ss:$0 sm:$0xff] }
  0x10   :  { %1371 = vmatmul.mubr.msk.f32.gmra.mrb[4].mxu0 %vm67_vm0, %v31_v15  ;;  %1395 = vmatmul.mubr.msk.f32.gmra.mrb[4].mxu1 %vm67_vm0, %v47_v20 }
  0x11   :  { %1373 = vmatprep.mubr.msk.f32.mxu0 %vm67_vm0, %v32_v19  ;;  %1397 = vmatprep.mubr.msk.f32.mxu1 %vm67_vm0, %v48_v22 }
  0x12   :  { %1537 = vmatprep.subr.bf16.mxu0 %v1536_v44 }
  0x13   :  { %1539 = vmatpush3.bf16.msra.mxu0 %v1536_v44 }
  0x14   :  { %1374 = vmatmul.mubr.msk.f32.gmra.mrb[6].mxu0 %vm67_vm0, %v33_v23  ;;  %1398 = vmatmul.mubr.msk.f32.gmra.mrb[6].mxu1 %vm67_vm0, %v49_v25 }
  0x15   :  { %1376 = vmatprep.mubr.msk.f32.mxu0 %vm67_vm0, %v34_v24  ;;  %1400 = vmatprep.mubr.msk.f32.mxu1 %vm67_vm0, %v50_v26 }
  0x16   :  { %1541 = vmatprep.subr.bf16.mxu0 %v1540_v46 }
  0x17   :  { %1543 = vmatpush3.bf16.msra.mxu0 %v1540_v46 }
  0x18   :  { %1377 = vmatmul.mubr.msk.f32.gmra.mrb[8].mxu0 %vm67_vm0, %v35_v27  ;;  %1401 = vmatmul.mubr.msk.f32.gmra.mrb[8].mxu1 %vm67_vm0, %v51_v29 }
  0x19   :  { %1379 = vmatprep.mubr.msk.f32.mxu0 %vm67_vm0, %v36_v28  ;;  %1403 = vmatprep.mubr.msk.f32.mxu1 %vm67_vm0, %v52_v30 }
  0x1c   :  { %1380 = vmatmul.mubr.msk.f32.gmra.mrb[10].mxu0 %vm67_vm0, %v37_v31  ;;  %1404 = vmatmul.mubr.msk.f32.gmra.mrb[10].mxu1 %vm67_vm0, %v53_v33 }
  0x1d   :  { %1382 = vmatprep.mubr.msk.f32.mxu0 %vm67_vm0, %v38_v32  ;;  %1406 = vmatprep.mubr.msk.f32.mxu1 %vm67_vm0, %v54_v34 }
  0x20   :  { %1383 = vmatmul.mubr.msk.f32.gmra.mrb[12].mxu0 %vm67_vm0, %v39_v35  ;;  %1407 = vmatmul.mubr.msk.f32.gmra.mrb[12].mxu1 %vm67_vm0, %v55_v37 }
  0x21   :  { %1385 = vmatprep.mubr.msk.f32.mxu0 %vm67_vm0, %v40_v36  ;;  %1409 = vmatprep.mubr.msk.f32.mxu1 %vm67_vm0, %v56_v38 }
  0x24   :  { %1386 = vmatmul.mubr.msk.f32.gmra.mrb[14].mxu0 %vm67_vm0, %v41_v39  ;;  %1410 = vmatmul.mubr.msk.f32.gmra.mrb[14].mxu1 %vm67_vm0, %v57_v40 }
  0xdb   :  { %v1366_v48 = vpop.f32.mrb[0].mxu0  ;;  %v1878_v51 = vpop.f32.mrb[0].mxu1 }
  0xdc   :  { %v236_v49 = vadd.f32 %v1366_v48, %v1875_v47  ;;  %v230_v50 = vpop.f32.mrb[1].mxu0  ;;  %v1881_v53 = vpop.f32.mrb[1].mxu1  ;;  %v316_v44 = vadd.f32 %v1878_v51, %v1875_v47 }
  0xdd   :  { %v231_v52 = vadd.f32 %v1875_v47, %v230_v50  ;;  %v311_v34 = vadd.f32 %v1875_v47, %v1881_v53 }
  0xdf   :  { %1546 = vtanh.f32 %v231_v52  ;;  %v1369_v54 = vpop.f32.mrb[2].mxu0  ;;  %v1884_v57 = vpop.f32.mrb[2].mxu1 }
  0xe0   :  { %1548 = vtanh.f32 %v236_v49  ;;  %v246_v55 = vadd.f32 %v1369_v54, %v1875_v47  ;;  %v240_v56 = vpop.f32.mrb[3].mxu0  ;;  %v1887_v59 = vpop.f32.mrb[3].mxu1  ;;  %v326_v49 = vadd.f32 %v1884_v57, %v1875_v47 }
  0xe1   :  { %v241_v58 = vadd.f32 %v1875_v47, %v240_v56  ;;  %v321_v43 = vadd.f32 %v1875_v47, %v1887_v59 }
  0xe3   :  { %1550 = vtanh.f32 %v241_v58  ;;  %v1372_v60 = vpop.f32.mrb[4].mxu0  ;;  %v1890_v63 = vpop.f32.mrb[4].mxu1 }
  0xe4   :  { %1552 = vtanh.f32 %v246_v55  ;;  %v256_v61 = vadd.f32 %v1372_v60, %v1875_v47  ;;  %v250_v62 = vpop.f32.mrb[5].mxu0  ;;  %v1893_v1 = vpop.f32.mrb[5].mxu1  ;;  %v336_v54 = vadd.f32 %v1890_v63, %v1875_v47 }
  0xe5   :  { %v251_v0 = vadd.f32 %v1875_v47, %v250_v62  ;;  %v331_v48 = vadd.f32 %v1875_v47, %v1893_v1 }
  0xe7   :  { %1554 = vtanh.f32 %v251_v0  ;;  %v1375_v2 = vpop.f32.mrb[6].mxu0  ;;  %v1896_v5 = vpop.f32.mrb[6].mxu1 }
  0xe8   :  { %1556 = vtanh.f32 %v256_v61  ;;  %v266_v3 = vadd.f32 %v1375_v2, %v1875_v47  ;;  %v260_v4 = vpop.f32.mrb[7].mxu0  ;;  %v1899_v8 = vpop.f32.mrb[7].mxu1  ;;  %v346_v58 = vadd.f32 %v1896_v5, %v1875_v47 }
  0xe9   :  { %v1547_v6 = vpop.eup %1546  ;;  %v261_v7 = vadd.f32 %v1875_v47, %v260_v4  ;;  %v341_v51 = vadd.f32 %v1875_v47, %v1899_v8 }
  0xea   :  { %v1549_v9 = vpop.eup %1548  ;;  %1420 = vmatprep.mubr.msk.f32.mxu1 %vm432_vm1, %v1547_v6 }
  0xeb   :  { %1558 = vtanh.f32 %v261_v7  ;;  %v1378_v10 = vpop.f32.mrb[8].mxu0  ;;  %1421 = vmatmul.mubr.msk.f32.vlgmr.msra.gmra.mrb[16].mxu1 %vm432_vm1, %v1549_v9  ;;  %v1904_v13 = vpop.f32.mrb[8].mxu1 }
  0xec   :  { %1560 = vtanh.f32 %v266_v3  ;;  %v276_v11 = vadd.f32 %v1378_v10, %v1875_v47  ;;  %v270_v12 = vpop.f32.mrb[9].mxu0  ;;  %v1907_v16 = vpop.f32.mrb[9].mxu1  ;;  %v356_v62 = vadd.f32 %v1904_v13, %v1875_v47 }
  0xed   :  { %v1551_v14 = vpop.eup %1550  ;;  %v271_v15 = vadd.f32 %v1875_v47, %v270_v12  ;;  %v351_v57 = vadd.f32 %v1875_v47, %v1907_v16  ;;  %v1986_v16 = vld [vmem:[%s2222_s4] ss:$0 sm:$0xff] }
  0xee   :  { %v1553_v17 = vpop.eup %1552  ;;  %1423 = vmatprep.mubr.msk.f32.mxu1 %vm432_vm1, %v1551_v14 }
  0xef   :  { %1562 = vtanh.f32 %v271_v15  ;;  %v1381_v18 = vpop.f32.mrb[10].mxu0  ;;  %1424 = vmatmul.mubr.msk.f32.gmra.mrb[18].mxu1 %vm432_vm1, %v1553_v17  ;;  %v1912_v21 = vpop.f32.mrb[10].mxu1 }
  0xf0   :  { %1564 = vtanh.f32 %v276_v11  ;;  %v286_v19 = vadd.f32 %v1381_v18, %v1875_v47  ;;  %v280_v20 = vpop.f32.mrb[11].mxu0  ;;  %v1915_v24 = vpop.f32.mrb[11].mxu1  ;;  %v366_v2 = vadd.f32 %v1912_v21, %v1875_v47 }
  0xf1   :  { %v1555_v22 = vpop.eup %1554  ;;  %v281_v23 = vadd.f32 %v1875_v47, %v280_v20  ;;  %v361_v61 = vadd.f32 %v1875_v47, %v1915_v24 }
  0xf2   :  { %v1557_v25 = vpop.eup %1556  ;;  %1426 = vmatprep.mubr.msk.f32.mxu1 %vm432_vm1, %v1555_v22 }
  0xf3   :  { %1566 = vtanh.f32 %v281_v23  ;;  %v1384_v26 = vpop.f32.mrb[12].mxu0  ;;  %1427 = vmatmul.mubr.msk.f32.gmra.mrb[20].mxu1 %vm432_vm1, %v1557_v25  ;;  %v1920_v29 = vpop.f32.mrb[12].mxu1 }
  0xf4   :  { %1568 = vtanh.f32 %v286_v19  ;;  %v296_v27 = vadd.f32 %v1384_v26, %v1875_v47  ;;  %v290_v28 = vpop.f32.mrb[13].mxu0  ;;  %v370_v32 = vpop.f32.mrb[13].mxu1  ;;  %v376_v6 = vadd.f32 %v1920_v29, %v1875_v47 }
  0xf5   :  { %v1559_v30 = vpop.eup %1558  ;;  %v291_v31 = vadd.f32 %v1875_v47, %v290_v28  ;;  %v371_v1 = vadd.f32 %v1875_v47, %v370_v32 }
  0xf6   :  { %v1561_v33 = vpop.eup %1560  ;;  %1429 = vmatprep.mubr.msk.f32.mxu1 %vm432_vm1, %v1559_v30 }
  0xf7   :  { %1570 = vtanh.f32 %v291_v31  ;;  %v1387_v35 = vpop.f32.mrb[14].mxu0  ;;  %1430 = vmatmul.mubr.msk.f32.gmra.mrb[22].mxu1 %vm432_vm1, %v1561_v33  ;;  %v1928_v38 = vpop.f32.mrb[14].mxu1 }
  0xf8   :  { %1572 = vtanh.f32 %v296_v27  ;;  %v306_v36 = vadd.f32 %v1387_v35, %v1875_v47  ;;  %v300_v37 = vpop.f32.mrb[15].mxu0  ;;  %v380_v41 = vpop.f32.mrb[15].mxu1  ;;  %v386_v9 = vadd.f32 %v1928_v38, %v1875_v47 }
  0xf9   :  { %v1563_v39 = vpop.eup %1562  ;;  %v301_v40 = vadd.f32 %v1875_v47, %v300_v37  ;;  %1574 = vtanh.f32 %v311_v34  ;;  %v381_v5 = vadd.f32 %v1875_v47, %v380_v41 }
  0xfa   :  { %v1565_v42 = vpop.eup %1564  ;;  %1432 = vmatprep.mubr.msk.f32.mxu1 %vm432_vm1, %v1563_v39 }
  0xfb   :  { %1576 = vtanh.f32 %v301_v40  ;;  %1433 = vmatmul.mubr.msk.f32.gmra.mrb[24].mxu1 %vm432_vm1, %v1565_v42 }
  0xfc   :  { %1578 = vtanh.f32 %v306_v36 }
  0xfd   :  { %v1567_v45 = vpop.eup %1566  ;;  %1580 = vtanh.f32 %v321_v43 }
  0xfe   :  { %v1569_v46 = vpop.eup %1568  ;;  %1435 = vmatprep.mubr.msk.f32.mxu1 %vm432_vm1, %v1567_v45  ;;  %1582 = vtanh.f32 %v316_v44 }
  0xff   :  { %1436 = vmatmul.mubr.msk.f32.gmra.mrb[26].mxu1 %vm432_vm1, %v1569_v46  ;;  %1584 = vtanh.f32 %v331_v48 }
 0x100   :  { %1586 = vtanh.f32 %v326_v49 }
 0x101   :  { %v1571_v50 = vpop.eup %1570  ;;  %1588 = vtanh.f32 %v341_v51 }
 0x102   :  { %v1573_v52 = vpop.eup %1572  ;;  %1438 = vmatprep.mubr.msk.f32.mxu1 %vm432_vm1, %v1571_v50  ;;  %1590 = vtanh.f32 %v336_v54 }
 0x103   :  { %1439 = vmatmul.mubr.msk.f32.gmra.mrb[28].mxu1 %vm432_vm1, %v1573_v52  ;;  %v1575_v53 = vpop.eup %1574  ;;  %1592 = vtanh.f32 %v351_v57 }
 0x104   :  { %1594 = vtanh.f32 %v346_v58 }
 0x105   :  { %v1577_v55 = vpop.eup %1576  ;;  %1596 = vtanh.f32 %v361_v61 }
 0x106   :  { %v1579_v56 = vpop.eup %1578  ;;  %1441 = vmatprep.mubr.msk.f32.mxu1 %vm432_vm1, %v1577_v55  ;;  %1598 = vtanh.f32 %v356_v62 }
 0x107   :  { %1442 = vmatmul.mubr.msk.f32.gmra.mrb[30].mxu1 %vm432_vm1, %v1579_v56  ;;  %v1581_v59 = vpop.eup %1580  ;;  %1600 = vtanh.f32 %v371_v1 }
 0x108   :  { %1444 = vmatprep.mubr.msk.f32.mxu1 %vm432_vm1, %v1575_v53  ;;  %v1583_v60 = vpop.eup %1582  ;;  %1602 = vtanh.f32 %v366_v2 }
 0x109   :  { %v1585_v63 = vpop.eup %1584  ;;  %1604 = vtanh.f32 %v381_v5 }
 0x10a   :  { %v1587_v0 = vpop.eup %1586  ;;  %1606 = vtanh.f32 %v376_v6 }
 0x10b   :  { %1445 = vmatmul.mubr.msk.f32.gmra.mrb[32].mxu1 %vm432_vm1, %v1583_v60  ;;  %v1589_v3 = vpop.eup %1588  ;;  %1608 = vtanh.f32 %v386_v9 }
 0x10c   :  { %1447 = vmatprep.mubr.msk.f32.mxu1 %vm432_vm1, %v1581_v59  ;;  %v1591_v4 = vpop.eup %1590 }
 0x10d   :  { %v1593_v7 = vpop.eup %1592 }
 0x10e   :  { %v1595_v8 = vpop.eup %1594 }
 0x10f   :  { %1448 = vmatmul.mubr.msk.f32.gmra.mrb[34].mxu1 %vm432_vm1, %v1587_v0  ;;  %v1597_v10 = vpop.eup %1596 }
 0x110   :  { %1450 = vmatprep.mubr.msk.f32.mxu1 %vm432_vm1, %v1585_v63  ;;  %v1599_v11 = vpop.eup %1598 }
 0x111   :  { %v1601_v12 = vpop.eup %1600 }
 0x112   :  { %v1603_v13 = vpop.eup %1602 }
 0x113   :  { %1451 = vmatmul.mubr.msk.f32.gmra.mrb[36].mxu1 %vm432_vm1, %v1591_v4  ;;  %v1605_v14 = vpop.eup %1604 }
 0x114   :  { %1453 = vmatprep.mubr.msk.f32.mxu1 %vm432_vm1, %v1589_v3  ;;  %v1607_v15 = vpop.eup %1606 }
 0x115   :  { %v1609_v47 = vpop.eup %1608 }
 0x117   :  { %1454 = vmatmul.mubr.msk.f32.gmra.mrb[38].mxu1 %vm432_vm1, %v1595_v8 }
 0x118   :  { %1456 = vmatprep.mubr.msk.f32.mxu1 %vm432_vm1, %v1593_v7 }
 0x11b   :  { %1457 = vmatmul.mubr.msk.f32.gmra.mrb[40].mxu1 %vm432_vm1, %v1599_v11 }
 0x11c   :  { %1459 = vmatprep.mubr.msk.f32.mxu1 %vm432_vm1, %v1597_v10 }
 0x11f   :  { %1460 = vmatmul.mubr.msk.f32.gmra.mrb[42].mxu1 %vm432_vm1, %v1603_v13 }
 0x120   :  { %1462 = vmatprep.mubr.msk.f32.mxu1 %vm432_vm1, %v1601_v12 }
 0x123   :  { %1463 = vmatmul.mubr.msk.f32.gmra.mrb[44].mxu1 %vm432_vm1, %v1607_v15 }
 0x124   :  { %1465 = vmatprep.mubr.msk.f32.mxu1 %vm432_vm1, %v1605_v14 }
 0x127   :  { %1466 = vmatmul.mubr.msk.f32.gmra.mrb[46].mxu1 %vm432_vm1, %v1609_v47 }
 0x1be   :  { %v1422_v17 = vpop.f32.mrb[16].mxu1 }
 0x1bf   :  { %v601_v18 = vadd.f32 %v1422_v17, %v1986_v16  ;;  %v595_v19 = vpop.f32.mrb[17].mxu1 }
 0x1c0   :  { %v596_v20 = vadd.f32 %v1986_v16, %v595_v19 }
 0x1c2   :  { %1610 = vtanh.f32 %v596_v20  ;;  %v1425_v21 = vpop.f32.mrb[18].mxu1 }
 0x1c3   :  { %1612 = vtanh.f32 %v601_v18  ;;  %v611_v22 = vadd.f32 %v1425_v21, %v1986_v16  ;;  %v605_v23 = vpop.f32.mrb[19].mxu1 }
 0x1c4   :  { %v606_v24 = vadd.f32 %v1986_v16, %v605_v23 }
 0x1c6   :  { %1614 = vtanh.f32 %v606_v24  ;;  %v1428_v25 = vpop.f32.mrb[20].mxu1 }
 0x1c7   :  { %1616 = vtanh.f32 %v611_v22  ;;  %v621_v26 = vadd.f32 %v1428_v25, %v1986_v16  ;;  %v615_v27 = vpop.f32.mrb[21].mxu1 }
 0x1c8   :  { %v616_v28 = vadd.f32 %v1986_v16, %v615_v27 }
 0x1ca   :  { %1618 = vtanh.f32 %v616_v28  ;;  %v1431_v29 = vpop.f32.mrb[22].mxu1 }
 0x1cb   :  { %1620 = vtanh.f32 %v621_v26  ;;  %v631_v30 = vadd.f32 %v1431_v29, %v1986_v16  ;;  %v625_v31 = vpop.f32.mrb[23].mxu1 }
 0x1cc   :  { %v1611_v32 = vpop.eup %1610  ;;  %v626_v33 = vadd.f32 %v1986_v16, %v625_v31 }
 0x1cd   :  { %v1613_v34 = vpop.eup %1612  ;;  %1476 = vmatprep.mubr.msk.f32.mxu0 %vm432_vm1, %v1611_v32 }
 0x1ce   :  { %1622 = vtanh.f32 %v626_v33  ;;  %v1434_v35 = vpop.f32.mrb[24].mxu1  ;;  %1477 = vmatmul.mubr.msk.f32.vlgmr.msra.gmra.mrb[16].mxu0 %vm432_vm1, %v1613_v34 }
 0x1cf   :  { %1624 = vtanh.f32 %v631_v30  ;;  %v641_v36 = vadd.f32 %v1434_v35, %v1986_v16  ;;  %v635_v37 = vpop.f32.mrb[25].mxu1 }
 0x1d0   :  { %v1615_v38 = vpop.eup %1614  ;;  %v636_v39 = vadd.f32 %v1986_v16, %v635_v37 }
 0x1d1   :  { %v1617_v40 = vpop.eup %1616  ;;  %1479 = vmatprep.mubr.msk.f32.mxu0 %vm432_vm1, %v1615_v38 }
 0x1d2   :  { %1626 = vtanh.f32 %v636_v39  ;;  %v1437_v41 = vpop.f32.mrb[26].mxu1  ;;  %1480 = vmatmul.mubr.msk.f32.gmra.mrb[18].mxu0 %vm432_vm1, %v1617_v40 }
 0x1d3   :  { %1628 = vtanh.f32 %v641_v36  ;;  %v651_v42 = vadd.f32 %v1437_v41, %v1986_v16  ;;  %v645_v43 = vpop.f32.mrb[27].mxu1 }
 0x1d4   :  { %v1619_v44 = vpop.eup %1618  ;;  %v646_v45 = vadd.f32 %v1986_v16, %v645_v43 }
 0x1d5   :  { %v1621_v46 = vpop.eup %1620  ;;  %1482 = vmatprep.mubr.msk.f32.mxu0 %vm432_vm1, %v1619_v44 }
 0x1d6   :  { %1630 = vtanh.f32 %v646_v45  ;;  %v1440_v48 = vpop.f32.mrb[28].mxu1  ;;  %1483 = vmatmul.mubr.msk.f32.gmra.mrb[20].mxu0 %vm432_vm1, %v1621_v46 }
 0x1d7   :  { %1632 = vtanh.f32 %v651_v42  ;;  %v661_v49 = vadd.f32 %v1440_v48, %v1986_v16  ;;  %v655_v50 = vpop.f32.mrb[29].mxu1 }
 0x1d8   :  { %v1623_v52 = vpop.eup %1622  ;;  %v656_v51 = vadd.f32 %v1986_v16, %v655_v50  ;;  %v2055_v50 = vld [vmem:[%s2223_s6] ss:$0 sm:$0xff] }
 0x1d9   :  { %v1625_v53 = vpop.eup %1624  ;;  %1485 = vmatprep.mubr.msk.f32.mxu0 %vm432_vm1, %v1623_v52 }
 0x1da   :  { %1634 = vtanh.f32 %v656_v51  ;;  %v1443_v54 = vpop.f32.mrb[30].mxu1  ;;  %1486 = vmatmul.mubr.msk.f32.gmra.mrb[22].mxu0 %vm432_vm1, %v1625_v53 }
 0x1db   :  { %1636 = vtanh.f32 %v661_v49  ;;  %v671_v55 = vadd.f32 %v1443_v54, %v1986_v16  ;;  %v665_v56 = vpop.f32.mrb[31].mxu1 }
 0x1dc   :  { %v1627_v57 = vpop.eup %1626  ;;  %v666_v58 = vadd.f32 %v1986_v16, %v665_v56 }
 0x1dd   :  { %v1629_v59 = vpop.eup %1628  ;;  %1488 = vmatprep.mubr.msk.f32.mxu0 %vm432_vm1, %v1627_v57 }
 0x1de   :  { %1638 = vtanh.f32 %v666_v58  ;;  %v1446_v60 = vpop.f32.mrb[32].mxu1  ;;  %1489 = vmatmul.mubr.msk.f32.gmra.mrb[24].mxu0 %vm432_vm1, %v1629_v59 }
 0x1df   :  { %1640 = vtanh.f32 %v671_v55  ;;  %v681_v61 = vadd.f32 %v1446_v60, %v1986_v16  ;;  %v675_v62 = vpop.f32.mrb[33].mxu1 }
 0x1e0   :  { %v1631_v63 = vpop.eup %1630  ;;  %v676_v0 = vadd.f32 %v1986_v16, %v675_v62 }
 0x1e1   :  { %v1633_v1 = vpop.eup %1632  ;;  %1491 = vmatprep.mubr.msk.f32.mxu0 %vm432_vm1, %v1631_v63 }
 0x1e2   :  { %1642 = vtanh.f32 %v676_v0  ;;  %v1449_v2 = vpop.f32.mrb[34].mxu1  ;;  %1492 = vmatmul.mubr.msk.f32.gmra.mrb[26].mxu0 %vm432_vm1, %v1633_v1 }
 0x1e3   :  { %1644 = vtanh.f32 %v681_v61  ;;  %v691_v3 = vadd.f32 %v1449_v2, %v1986_v16  ;;  %v685_v4 = vpop.f32.mrb[35].mxu1 }
 0x1e4   :  { %v1635_v5 = vpop.eup %1634  ;;  %v686_v6 = vadd.f32 %v1986_v16, %v685_v4 }
 0x1e5   :  { %v1637_v7 = vpop.eup %1636  ;;  %1494 = vmatprep.mubr.msk.f32.mxu0 %vm432_vm1, %v1635_v5 }
 0x1e6   :  { %1646 = vtanh.f32 %v686_v6  ;;  %v1452_v8 = vpop.f32.mrb[36].mxu1  ;;  %1495 = vmatmul.mubr.msk.f32.gmra.mrb[28].mxu0 %vm432_vm1, %v1637_v7 }
 0x1e7   :  { %1648 = vtanh.f32 %v691_v3  ;;  %v701_v9 = vadd.f32 %v1452_v8, %v1986_v16  ;;  %v695_v10 = vpop.f32.mrb[37].mxu1 }
 0x1e8   :  { %v1639_v11 = vpop.eup %1638  ;;  %v696_v12 = vadd.f32 %v1986_v16, %v695_v10 }
 0x1e9   :  { %v1641_v13 = vpop.eup %1640  ;;  %1497 = vmatprep.mubr.msk.f32.mxu0 %vm432_vm1, %v1639_v11 }
 0x1ea   :  { %1650 = vtanh.f32 %v696_v12  ;;  %v1455_v14 = vpop.f32.mrb[38].mxu1  ;;  %1498 = vmatmul.mubr.msk.f32.gmra.mrb[30].mxu0 %vm432_vm1, %v1641_v13 }
 0x1eb   :  { %1652 = vtanh.f32 %v701_v9  ;;  %v711_v15 = vadd.f32 %v1455_v14, %v1986_v16  ;;  %v705_v47 = vpop.f32.mrb[39].mxu1 }
 0x1ec   :  { %v1643_v17 = vpop.eup %1642  ;;  %v706_v18 = vadd.f32 %v1986_v16, %v705_v47 }
 0x1ed   :  { %v1645_v19 = vpop.eup %1644  ;;  %1500 = vmatprep.mubr.msk.f32.mxu0 %vm432_vm1, %v1643_v17 }
 0x1ee   :  { %1654 = vtanh.f32 %v706_v18  ;;  %v1458_v20 = vpop.f32.mrb[40].mxu1  ;;  %1501 = vmatmul.mubr.msk.f32.gmra.mrb[32].mxu0 %vm432_vm1, %v1645_v19 }
 0x1ef   :  { %1656 = vtanh.f32 %v711_v15  ;;  %v721_v21 = vadd.f32 %v1458_v20, %v1986_v16  ;;  %v715_v22 = vpop.f32.mrb[41].mxu1 }
 0x1f0   :  { %v1647_v23 = vpop.eup %1646  ;;  %v716_v24 = vadd.f32 %v1986_v16, %v715_v22 }
 0x1f1   :  { %v1649_v25 = vpop.eup %1648  ;;  %1503 = vmatprep.mubr.msk.f32.mxu0 %vm432_vm1, %v1647_v23 }
 0x1f2   :  { %1658 = vtanh.f32 %v716_v24  ;;  %v1461_v26 = vpop.f32.mrb[42].mxu1  ;;  %1504 = vmatmul.mubr.msk.f32.gmra.mrb[34].mxu0 %vm432_vm1, %v1649_v25 }
 0x1f3   :  { %1660 = vtanh.f32 %v721_v21  ;;  %v731_v27 = vadd.f32 %v1461_v26, %v1986_v16  ;;  %v725_v28 = vpop.f32.mrb[43].mxu1 }
 0x1f4   :  { %v1651_v29 = vpop.eup %1650  ;;  %v726_v30 = vadd.f32 %v1986_v16, %v725_v28 }
 0x1f5   :  { %v1653_v31 = vpop.eup %1652  ;;  %1506 = vmatprep.mubr.msk.f32.mxu0 %vm432_vm1, %v1651_v29 }
 0x1f6   :  { %1662 = vtanh.f32 %v726_v30  ;;  %v1464_v32 = vpop.f32.mrb[44].mxu1  ;;  %1507 = vmatmul.mubr.msk.f32.gmra.mrb[36].mxu0 %vm432_vm1, %v1653_v31 }
 0x1f7   :  { %1664 = vtanh.f32 %v731_v27  ;;  %v741_v33 = vadd.f32 %v1464_v32, %v1986_v16  ;;  %v735_v34 = vpop.f32.mrb[45].mxu1 }
 0x1f8   :  { %v1655_v35 = vpop.eup %1654  ;;  %v736_v36 = vadd.f32 %v1986_v16, %v735_v34 }
 0x1f9   :  { %v1657_v37 = vpop.eup %1656  ;;  %1509 = vmatprep.mubr.msk.f32.mxu0 %vm432_vm1, %v1655_v35 }
 0x1fa   :  { %1666 = vtanh.f32 %v736_v36  ;;  %v1467_v38 = vpop.f32.mrb[46].mxu1  ;;  %1510 = vmatmul.mubr.msk.f32.gmra.mrb[38].mxu0 %vm432_vm1, %v1657_v37 }
 0x1fb   :  { %1668 = vtanh.f32 %v741_v33  ;;  %v751_v39 = vadd.f32 %v1467_v38, %v1986_v16  ;;  %v745_v40 = vpop.f32.mrb[47].mxu1 }
 0x1fc   :  { %v1659_v41 = vpop.eup %1658  ;;  %v746_v42 = vadd.f32 %v1986_v16, %v745_v40 }
 0x1fd   :  { %v1661_v43 = vpop.eup %1660  ;;  %1512 = vmatprep.mubr.msk.f32.mxu0 %vm432_vm1, %v1659_v41 }
 0x1fe   :  { %1670 = vtanh.f32 %v746_v42  ;;  %1513 = vmatmul.mubr.msk.f32.gmra.mrb[40].mxu0 %vm432_vm1, %v1661_v43 }
 0x1ff   :  { %1672 = vtanh.f32 %v751_v39 }
 0x200   :  { %v1663_v44 = vpop.eup %1662 }
 0x201   :  { %v1665_v45 = vpop.eup %1664  ;;  %1515 = vmatprep.mubr.msk.f32.mxu0 %vm432_vm1, %v1663_v44 }
 0x202   :  { %1516 = vmatmul.mubr.msk.f32.gmra.mrb[42].mxu0 %vm432_vm1, %v1665_v45 }
 0x204   :  { %v1667_v46 = vpop.eup %1666 }
 0x205   :  { %v1669_v48 = vpop.eup %1668  ;;  %1518 = vmatprep.mubr.msk.f32.mxu0 %vm432_vm1, %v1667_v46 }
 0x206   :  { %1519 = vmatmul.mubr.msk.f32.gmra.mrb[44].mxu0 %vm432_vm1, %v1669_v48 }
 0x208   :  { %v1671_v16 = vpop.eup %1670 }
 0x209   :  { %v1673_v49 = vpop.eup %1672  ;;  %1521 = vmatprep.mubr.msk.f32.mxu0 %vm432_vm1, %v1671_v16 }
 0x20a   :  { %1522 = vmatmul.mubr.msk.f32.gmra.mrb[46].mxu0 %vm432_vm1, %v1673_v49 }
 0x2a1   :  { %v1478_v52 = vpop.f32.mrb[16].mxu0 }
 0x2a2   :  { %v965_v51 = vadd.f32 %v1478_v52, %v2055_v50  ;;  %v959_v53 = vpop.f32.mrb[17].mxu0 }
 0x2a3   :  { %v960_v54 = vadd.f32 %v2055_v50, %v959_v53 }
 0x2a4   :  { %1120 = vst.msk [vmem:[%s2224_s7 + $0x8] sm:$0xff] %vm1118_vm2, %v965_v51 }
 0x2a5   :  { %1119 = vst.msk [vmem:[%s2224_s7] sm:$0xff] %vm1118_vm2, %v960_v54  ;;  %v1481_v55 = vpop.f32.mrb[18].mxu0 }
 0x2a6   :  { %v975_v56 = vadd.f32 %v1481_v55, %v2055_v50  ;;  %v969_v57 = vpop.f32.mrb[19].mxu0 }
 0x2a7   :  { %v970_v58 = vadd.f32 %v2055_v50, %v969_v57 }
 0x2a8   :  { %1122 = vst.msk [vmem:[%s2224_s7 + $0x18] sm:$0xff] %vm1118_vm2, %v975_v56 }
 0x2a9   :  { %1121 = vst.msk [vmem:[%s2224_s7 + $0x10] sm:$0xff] %vm1118_vm2, %v970_v58  ;;  %v1484_v59 = vpop.f32.mrb[20].mxu0 }
 0x2aa   :  { %v985_v60 = vadd.f32 %v1484_v59, %v2055_v50  ;;  %v979_v61 = vpop.f32.mrb[21].mxu0 }
 0x2ab   :  { %v980_v62 = vadd.f32 %v2055_v50, %v979_v61 }
 0x2ac   :  { %1124 = vst.msk [vmem:[%s2224_s7 + $0x28] sm:$0xff] %vm1118_vm2, %v985_v60 }
 0x2ad   :  { %1123 = vst.msk [vmem:[%s2224_s7 + $0x20] sm:$0xff] %vm1118_vm2, %v980_v62  ;;  %v1487_v63 = vpop.f32.mrb[22].mxu0 }
 0x2ae   :  { %v995_v0 = vadd.f32 %v1487_v63, %v2055_v50  ;;  %v989_v1 = vpop.f32.mrb[23].mxu0 }
 0x2af   :  { %v990_v2 = vadd.f32 %v2055_v50, %v989_v1 }
 0x2b0   :  { %1126 = vst.msk [vmem:[%s2224_s7 + $0x38] sm:$0xff] %vm1118_vm2, %v995_v0 }
 0x2b1   :  { %1125 = vst.msk [vmem:[%s2224_s7 + $0x30] sm:$0xff] %vm1118_vm2, %v990_v2  ;;  %v1490_v3 = vpop.f32.mrb[24].mxu0 }
 0x2b2   :  { %v1005_v4 = vadd.f32 %v1490_v3, %v2055_v50  ;;  %v999_v5 = vpop.f32.mrb[25].mxu0 }
 0x2b3   :  { %v1000_v6 = vadd.f32 %v2055_v50, %v999_v5 }
 0x2b4   :  { %1128 = vst.msk [vmem:[%s2224_s7 + $0x48] sm:$0xff] %vm1118_vm2, %v1005_v4 }
 0x2b5   :  { %1127 = vst.msk [vmem:[%s2224_s7 + $0x40] sm:$0xff] %vm1118_vm2, %v1000_v6  ;;  %v1493_v7 = vpop.f32.mrb[26].mxu0 }
 0x2b6   :  { %v1015_v8 = vadd.f32 %v1493_v7, %v2055_v50  ;;  %v1009_v9 = vpop.f32.mrb[27].mxu0 }
 0x2b7   :  { %v1010_v10 = vadd.f32 %v2055_v50, %v1009_v9 }
 0x2b8   :  { %1130 = vst.msk [vmem:[%s2224_s7 + $0x58] sm:$0xff] %vm1118_vm2, %v1015_v8 }
 0x2b9   :  { %1129 = vst.msk [vmem:[%s2224_s7 + $0x50] sm:$0xff] %vm1118_vm2, %v1010_v10  ;;  %v1496_v11 = vpop.f32.mrb[28].mxu0 }
 0x2ba   :  { %v1025_v12 = vadd.f32 %v1496_v11, %v2055_v50  ;;  %v1019_v13 = vpop.f32.mrb[29].mxu0 }
 0x2bb   :  { %v1020_v14 = vadd.f32 %v2055_v50, %v1019_v13 }
 0x2bc   :  { %1132 = vst.msk [vmem:[%s2224_s7 + $0x68] sm:$0xff] %vm1118_vm2, %v1025_v12 }
 0x2bd   :  { %1131 = vst.msk [vmem:[%s2224_s7 + $0x60] sm:$0xff] %vm1118_vm2, %v1020_v14  ;;  %v1499_v15 = vpop.f32.mrb[30].mxu0 }
 0x2be   :  { %v1035_v47 = vadd.f32 %v1499_v15, %v2055_v50  ;;  %v1029_v17 = vpop.f32.mrb[31].mxu0 }
 0x2bf   :  { %v1030_v18 = vadd.f32 %v2055_v50, %v1029_v17 }
 0x2c0   :  { %1134 = vst.msk [vmem:[%s2224_s7 + $0x78] sm:$0xff] %vm1118_vm2, %v1035_v47 }
 0x2c1   :  { %1133 = vst.msk [vmem:[%s2224_s7 + $0x70] sm:$0xff] %vm1118_vm2, %v1030_v18  ;;  %v1502_v19 = vpop.f32.mrb[32].mxu0 }
 0x2c2   :  { %v1045_v20 = vadd.f32 %v1502_v19, %v2055_v50  ;;  %v1039_v21 = vpop.f32.mrb[33].mxu0 }
 0x2c3   :  { %v1040_v22 = vadd.f32 %v2055_v50, %v1039_v21 }
 0x2c4   :  { %1136 = vst.msk [vmem:[%s2224_s7 + $0x88] sm:$0xff] %vm1118_vm2, %v1045_v20 }
 0x2c5   :  { %1135 = vst.msk [vmem:[%s2224_s7 + $0x80] sm:$0xff] %vm1118_vm2, %v1040_v22  ;;  %v1505_v23 = vpop.f32.mrb[34].mxu0 }
 0x2c6   :  { %v1055_v24 = vadd.f32 %v1505_v23, %v2055_v50  ;;  %v1049_v25 = vpop.f32.mrb[35].mxu0 }
 0x2c7   :  { %v1050_v26 = vadd.f32 %v2055_v50, %v1049_v25 }
 0x2c8   :  { %1138 = vst.msk [vmem:[%s2224_s7 + $0x98] sm:$0xff] %vm1118_vm2, %v1055_v24 }
 0x2c9   :  { %1137 = vst.msk [vmem:[%s2224_s7 + $0x90] sm:$0xff] %vm1118_vm2, %v1050_v26  ;;  %v1508_v27 = vpop.f32.mrb[36].mxu0 }
 0x2ca   :  { %v1065_v28 = vadd.f32 %v1508_v27, %v2055_v50  ;;  %v1059_v29 = vpop.f32.mrb[37].mxu0 }
 0x2cb   :  { %v1060_v30 = vadd.f32 %v2055_v50, %v1059_v29 }
 0x2cc   :  { %1140 = vst.msk [vmem:[%s2224_s7 + $0xa8] sm:$0xff] %vm1118_vm2, %v1065_v28 }
 0x2cd   :  { %1139 = vst.msk [vmem:[%s2224_s7 + $0xa0] sm:$0xff] %vm1118_vm2, %v1060_v30  ;;  %v1511_v31 = vpop.f32.mrb[38].mxu0 }
 0x2ce   :  { %v1075_v32 = vadd.f32 %v1511_v31, %v2055_v50  ;;  %v1069_v33 = vpop.f32.mrb[39].mxu0 }
 0x2cf   :  { %v1070_v34 = vadd.f32 %v2055_v50, %v1069_v33 }
 0x2d0   :  { %1142 = vst.msk [vmem:[%s2224_s7 + $0xb8] sm:$0xff] %vm1118_vm2, %v1075_v32 }
 0x2d1   :  { %1141 = vst.msk [vmem:[%s2224_s7 + $0xb0] sm:$0xff] %vm1118_vm2, %v1070_v34  ;;  %v1514_v35 = vpop.f32.mrb[40].mxu0 }
 0x2d2   :  { %v1085_v36 = vadd.f32 %v1514_v35, %v2055_v50  ;;  %v1079_v37 = vpop.f32.mrb[41].mxu0 }
 0x2d3   :  { %v1080_v38 = vadd.f32 %v2055_v50, %v1079_v37 }
 0x2d4   :  { %1144 = vst.msk [vmem:[%s2224_s7 + $0xc8] sm:$0xff] %vm1118_vm2, %v1085_v36 }
 0x2d5   :  { %1143 = vst.msk [vmem:[%s2224_s7 + $0xc0] sm:$0xff] %vm1118_vm2, %v1080_v38  ;;  %v1517_v39 = vpop.f32.mrb[42].mxu0 }
 0x2d6   :  { %v1095_v40 = vadd.f32 %v1517_v39, %v2055_v50  ;;  %v1089_v41 = vpop.f32.mrb[43].mxu0 }
 0x2d7   :  { %v1090_v42 = vadd.f32 %v2055_v50, %v1089_v41 }
 0x2d8   :  { %1146 = vst.msk [vmem:[%s2224_s7 + $0xd8] sm:$0xff] %vm1118_vm2, %v1095_v40 }
 0x2d9   :  { %1145 = vst.msk [vmem:[%s2224_s7 + $0xd0] sm:$0xff] %vm1118_vm2, %v1090_v42  ;;  %v1520_v43 = vpop.f32.mrb[44].mxu0 }
 0x2da   :  { %v1105_v44 = vadd.f32 %v1520_v43, %v2055_v50  ;;  %v1099_v45 = vpop.f32.mrb[45].mxu0 }
 0x2db   :  { %v1100_v46 = vadd.f32 %v2055_v50, %v1099_v45 }
 0x2dc   :  { %1148 = vst.msk [vmem:[%s2224_s7 + $0xe8] sm:$0xff] %vm1118_vm2, %v1105_v44 }
 0x2dd   :  { %1147 = vst.msk [vmem:[%s2224_s7 + $0xe0] sm:$0xff] %vm1118_vm2, %v1100_v46  ;;  %v1523_v48 = vpop.f32.mrb[46].mxu0 }
 0x2de   :  { %v1115_v16 = vadd.f32 %v1523_v48, %v2055_v50  ;;  %v1109_v49 = vpop.f32.mrb[47].mxu0 }
 0x2df   :  { %v1110_v52 = vadd.f32 %v2055_v50, %v1109_v49 }
 0x2e0   :  { %1150 = vst.msk [vmem:[%s2224_s7 + $0xf8] sm:$0xff] %vm1118_vm2, %v1115_v16 }
 0x2e1   :  { %1149 = vst.msk [vmem:[%s2224_s7 + $0xf0] sm:$0xff] %vm1118_vm2, %v1110_v52 }

</bundles_post_ra>
